<compile_context>
chip_gen: v6e
topology: v6e:2x2x1
jax: 0.10.0
libtpu: 0.0.40
codegen_flags: <defaults>
</compile_context>

<pallas_src>
import jax
import jax.numpy as jnp
from jax.experimental import pallas as pl
from jax.experimental.pallas import tpu as pltpu

NEG_SLOPE = 0.01  # nn.LeakyReLU default negative_slope
LANE = 128


def ffn2_kernel(x_ref, w1_ref, b1_ref, w2_ref, b2_ref, o_ref, acc_ref):
    # TODO(synk): dropout (p=0.1) is identity in eval mode; training-mode dropout
    #             would use pltpu.prng_seed / pltpu.prng_random_bits.
    k = pl.program_id(1)

    @pl.when(k == 0)
    def _():
        acc_ref[...] = jnp.zeros_like(acc_ref)

    x = x_ref[...]  # native dtype -> bf16 MXU fast path when inputs are bf16

    # fc1 slab: (tb, Din_p) @ (Din_p, th), f32 accumulation on the MXU
    h = jnp.dot(x, w1_ref[...], preferred_element_type=jnp.float32)
    h = h + b1_ref[...].astype(jnp.float32)

    # LeakyReLU in f32 on the VPU (elementwise -> exact per hidden slab;
    # v5e has no bf16 VALU)
    h = jnp.where(h > 0, h, NEG_SLOPE * h)

    # Downcast to the weight dtype so fc2 also runs the fast MXU path
    h = h.astype(w2_ref.dtype)

    # fc2 partial: (tb, th) @ (th, Dout_p), accumulated over the hidden grid axis
    acc_ref[...] += jnp.dot(h, w2_ref[...], preferred_element_type=jnp.float32)

    @pl.when(k == pl.num_programs(1) - 1)
    def _():
        y = acc_ref[...] + b2_ref[...].astype(jnp.float32)
        o_ref[...] = y.astype(o_ref.dtype)


def _round_up(v, m):
    return (v + m - 1) // m * m


def _pad2d(a, rows, cols):
    pr, pc = rows - a.shape[0], cols - a.shape[1]
    if pr or pc:
        a = jnp.pad(a, ((0, pr), (0, pc)))
    return a


def prepare_ffn_params(w1, b1, w2, b2, compute_dtype=None):
    """Zero-pad feature dims to lane multiples ONCE at load time (hoisted out of the
    per-call hot path; zero padding is numerically exact).  Optionally cast weights to
    a narrower MXU dtype (e.g. bf16 on v5e) — off by default to keep the f32 path exact."""
    d_in, hidden = w1.shape
    d_out = w2.shape[1]
    if compute_dtype is not None:
        w1, b1, w2, b2 = (a.astype(compute_dtype) for a in (w1, b1, w2, b2))
    din_p = _round_up(d_in, LANE)
    h_p = _round_up(hidden, LANE)
    dout_p = _round_up(d_out, LANE)
    return dict(
        w1=_pad2d(w1, din_p, h_p),
        b1=_pad2d(b1.reshape(1, -1), 1, h_p),
        w2=_pad2d(w2, h_p, dout_p),
        b2=_pad2d(b2.reshape(1, -1), 1, dout_p),
        d_in=d_in, d_out=d_out)


def _auto_tb(batch, dtype):
    """Batch tile: sublane-aligned, <=512 rows, and >=2 grid steps whenever the batch
    allows (lets the 'parallel' batch axis shard across v7x's two TensorCores; the
    ~0.35us/step overhead is negligible on 1-TC v5e/v6e)."""
    sub = 16 if dtype == jnp.bfloat16 else 8
    if batch <= sub:
        return sub
    return min(512, _round_up(pl.cdiv(batch, 2), sub))


def _auto_th(h_p):
    """Hidden-reduction slab: largest multiple of 128 dividing H_p, capped at 512.
    Bounds resident weight tiles and overlaps weight DMA with MXU compute."""
    best = LANE
    t = LANE
    while t <= min(h_p, 512):
        if h_p % t == 0:
            best = t
        t += LANE
    return best


def ffn_2layer(x, params, *, tb=None, th=None):
    """Inference forward of FFN_2layer: fc2(leaky_relu(fc1(x))); dropout = identity.

    x: (B, D_in).  params: output of prepare_ffn_params (weights stored transposed
    vs. PyTorch nn.Linear, i.e. (in_features, out_features))."""
    B, d_in = x.shape
    assert d_in == params["d_in"]
    w1p, b1p, w2p, b2p = params["w1"], params["b1"], params["w2"], params["b2"]
    din_p, h_p = w1p.shape
    dout_p = w2p.shape[1]
    d_out = params["d_out"]

    if tb is None:
        tb = _auto_tb(B, x.dtype)
    if th is None:
        th = _auto_th(h_p)
    assert h_p % th == 0 and th % LANE == 0

    # Pad batch up to a tile multiple (zero rows, sliced off after) and the fc1
    # contraction dim up to the lane-padded D_in -> lane-dense x loads, aligned MXU K.
    b_p = _round_up(B, tb)
    xp = _pad2d(x, b_p, din_p)

    grid_b = b_p // tb
    nk = h_p // th

    # Explicit VMEM budget: double-buffered streaming tiles, single-buffered
    # constant-index operands, f32 accumulator + h-slab headroom.
    xbytes = jnp.dtype(x.dtype).itemsize
    wbytes = jnp.dtype(w1p.dtype).itemsize
    wbuf = 1 if nk == 1 else 2
    needed = (tb * din_p * xbytes * 2          # x tile (double-buffered)
              + din_p * th * wbytes * wbuf     # w1 slab
              + th * wbytes * wbuf             # b1 slab
              + th * dout_p * wbytes * wbuf    # w2 slab
              + dout_p * wbytes                # b2 (Buffered(1))
              + tb * dout_p * xbytes * 2       # out tile (double-buffered)
              + tb * dout_p * 4                # f32 accumulator scratch
              + tb * th * 4)                   # h slab (possible vreg spill)
    vmem_limit = int(min(max(needed + (8 << 20), 32 << 20), 128 << 20))

    cost = pl.CostEstimate(
        flops=2 * b_p * (din_p * h_p + h_p * dout_p),
        transcendentals=0,
        bytes_accessed=int(xp.size * xbytes
                           + (w1p.size + b1p.size + w2p.size + b2p.size) * wbytes
                           + b_p * dout_p * xbytes),
    )

    # Constant-index operands: single-buffered (their block index never changes).
    def _const_spec(shape):
        return pl.BlockSpec(shape, lambda i, k: (0, 0), pipeline_mode=pl.Buffered(1))

    def _wspec(shape, imap):
        if nk == 1:  # hidden axis collapses -> weight slabs are constant-index too
            return pl.BlockSpec(shape, imap, pipeline_mode=pl.Buffered(1))
        return pl.BlockSpec(shape, imap)

    out_padded = pl.pallas_call(
        ffn2_kernel,
        out_shape=jax.ShapeDtypeStruct((b_p, dout_p), x.dtype),
        grid_spec=pltpu.PrefetchScalarGridSpec(
            num_scalar_prefetch=0,
            grid=(grid_b, nk),                                   # reduction axis last
            in_specs=[
                pl.BlockSpec((tb, din_p), lambda i, k: (i, 0)),  # x tile
                _wspec((din_p, th), lambda i, k: (0, k)),        # w1 slab
                _wspec((1, th), lambda i, k: (0, k)),            # b1 slab
                _wspec((th, dout_p), lambda i, k: (k, 0)),       # w2 slab
                _const_spec((1, dout_p)),                        # b2
            ],
            out_specs=pl.BlockSpec((tb, dout_p), lambda i, k: (i, 0)),
            scratch_shapes=[pltpu.VMEM((tb, dout_p), jnp.float32)],
        ),
        compiler_params=pltpu.CompilerParams(
            dimension_semantics=("parallel", "arbitrary"),
            vmem_limit_bytes=vmem_limit),
        cost_estimate=cost,
    )(xp, w1p, b1p, w2p, b2p)

    return out_padded[:B, :d_out]


def init_linear_params(key, fan_in, fan_out):
    """Deterministic init mimicking PyTorch nn.Linear default: U(-1/sqrt(in), 1/sqrt(in))."""
    kw, kb = jax.random.split(key)
    bound = 1.0 / (fan_in ** 0.5)
    # stored transposed: (in_features, out_features)
    w = jax.random.uniform(kw, (fan_in, fan_out), jnp.float32, -bound, bound)
    b = jax.random.uniform(kb, (1, fan_out), jnp.float32, -bound, bound)
    return w, b


if __name__ == "__main__":
    batch = 16
    input_size = 32
    hidden_size = 64
    output_size = 16

    key = jax.random.PRNGKey(0)
    kx, k1, k2 = jax.random.split(key, 3)

    x = jax.random.normal(kx, (batch, input_size), jnp.float32)
    w1, b1 = init_linear_params(k1, input_size, hidden_size)
    w2, b2 = init_linear_params(k2, hidden_size, output_size)

    # Pad weights once, outside the per-call hot path.
    params = prepare_ffn_params(w1, b1, w2, b2)

    out = jax.block_until_ready(ffn_2layer(x, params))

    # Pure-JAX reference (eval-mode dropout = identity)
    h_ref = x @ w1 + b1
    h_ref = jnp.where(h_ref > 0, h_ref, NEG_SLOPE * h_ref)
    y_ref = h_ref @ w2 + b2

    assert out.shape == (batch, output_size)
    err = float(jnp.max(jnp.abs(out - y_ref)))
    assert jnp.allclose(out, y_ref, atol=1e-4, rtol=1e-4), err

    print("KERNEL_OK")
</pallas_src>

<mosaic_0001>
module attributes {stable_mosaic.version = 11 : i64} {
  func.func @ffn2_kernel(%arg0: i32, %arg1: i32, %arg2: memref<8x128xf32, #tpu.memory_space<vmem>>, %arg3: memref<128x128xf32, #tpu.memory_space<vmem>>, %arg4: memref<1x128xf32, #tpu.memory_space<vmem>>, %arg5: memref<128x128xf32, #tpu.memory_space<vmem>>, %arg6: memref<1x128xf32, #tpu.memory_space<vmem>>, %arg7: memref<8x128xf32, #tpu.memory_space<vmem>>, %arg8: memref<8x128xf32, #tpu.memory_space<vmem>>) attributes {dimension_semantics = [#tpu.dimension_semantics<parallel>, #tpu.dimension_semantics<arbitrary>], iteration_bounds = array<i64: 2, 1>, scalar_prefetch = 0 : i64, scratch_operands = 1 : i64, tpu.core_type = #tpu.core_type<tc>, window_params = [{transform_indices = @transform_0, window_bounds = array<i64: 8, 128>}, {pipeline_mode = #tpu.pipeline_mode<synchronous>, transform_indices = @transform_1, window_bounds = array<i64: 128, 128>}, {pipeline_mode = #tpu.pipeline_mode<synchronous>, transform_indices = @transform_2, window_bounds = array<i64: 1, 128>}, {pipeline_mode = #tpu.pipeline_mode<synchronous>, transform_indices = @transform_3, window_bounds = array<i64: 128, 128>}, {pipeline_mode = #tpu.pipeline_mode<synchronous>, transform_indices = @transform_4, window_bounds = array<i64: 1, 128>}, {transform_indices = @transform_5, window_bounds = array<i64: 8, 128>}]} {
    %c0_i32 = arith.constant 0 : i32
    %0 = arith.cmpi eq, %arg1, %c0_i32 : i32
    %1 = arith.extui %0 : i1 to i32
    %c0_i32_0 = arith.constant 0 : i32
    %2 = arith.cmpi ne, %1, %c0_i32_0 : i32
    scf.if %2 {
      %cst_17 = arith.constant 0.000000e+00 : f32
      %22 = vector.broadcast %cst_17 : f32 to vector<8x128xf32>
      %c0_18 = arith.constant 0 : index
      %c0_19 = arith.constant 0 : index
      %23 = vector.load %arg8[%c0_18, %c0_19] : memref<8x128xf32, #tpu.memory_space<vmem>>, vector<8x128xf32>
      tpu.vector_store %arg8[%c0_18, %c0_19], %22 {strides = array<i32>} : memref<8x128xf32, #tpu.memory_space<vmem>>, vector<8x128xf32>,
    } else {
    }
    %c0 = arith.constant 0 : index
    %c0_1 = arith.constant 0 : index
    %3 = vector.load %arg2[%c0, %c0_1] : memref<8x128xf32, #tpu.memory_space<vmem>>, vector<8x128xf32>
    %c0_2 = arith.constant 0 : index
    %c0_3 = arith.constant 0 : index
    %4 = vector.load %arg3[%c0_2, %c0_3] : memref<128x128xf32, #tpu.memory_space<vmem>>, vector<128x128xf32>
    %cst = arith.constant dense<0.000000e+00> : vector<8x128xf32>
    %5 = tpu.matmul %3, %4, %cst {dimension_numbers = #tpu.dot_dimension_numbers<[1], [0], [0], [1], [0, 0, 1, 1], [], []>} : vector<8x128xf32>, vector<128x128xf32>, vector<8x128xf32> -> vector<8x128xf32>
    %c0_4 = arith.constant 0 : index
    %c0_5 = arith.constant 0 : index
    %6 = vector.load %arg4[%c0_4, %c0_5] : memref<1x128xf32, #tpu.memory_space<vmem>>, vector<1x128xf32>
    %7 = vector.broadcast %6 : vector<1x128xf32> to vector<8x128xf32>
    %8 = arith.addf %5, %7 : vector<8x128xf32>
    %cst_6 = arith.constant 0.000000e+00 : f32
    %9 = vector.broadcast %cst_6 : f32 to vector<8x128xf32>
    %10 = arith.cmpf ogt, %8, %9 : vector<8x128xf32>
    %cst_7 = arith.constant 0.00999999977 : f32
    %11 = vector.broadcast %cst_7 : f32 to vector<8x128xf32>
    %12 = arith.mulf %11, %8 : vector<8x128xf32>
    %13 = arith.select %10, %8, %12 : vector<8x128xi1>, vector<8x128xf32>
    %c0_8 = arith.constant 0 : index
    %c0_9 = arith.constant 0 : index
    %14 = vector.load %arg8[%c0_8, %c0_9] : memref<8x128xf32, #tpu.memory_space<vmem>>, vector<8x128xf32>
    %c0_10 = arith.constant 0 : index
    %c0_11 = arith.constant 0 : index
    %15 = vector.load %arg5[%c0_10, %c0_11] : memref<128x128xf32, #tpu.memory_space<vmem>>, vector<128x128xf32>
    %cst_12 = arith.constant dense<0.000000e+00> : vector<8x128xf32>
    %16 = tpu.matmul %13, %15, %cst_12 {dimension_numbers = #tpu.dot_dimension_numbers<[1], [0], [0], [1], [0, 0, 1, 1], [], []>} : vector<8x128xf32>, vector<128x128xf32>, vector<8x128xf32> -> vector<8x128xf32>
    %17 = arith.addf %14, %16 : vector<8x128xf32>
    %c0_13 = arith.constant 0 : index
    %c0_14 = arith.constant 0 : index
    %18 = vector.load %arg8[%c0_13, %c0_14] : memref<8x128xf32, #tpu.memory_space<vmem>>, vector<8x128xf32>
    tpu.vector_store %arg8[%c0_13, %c0_14], %17 {strides = array<i32>} : memref<8x128xf32, #tpu.memory_space<vmem>>, vector<8x128xf32>,
    %c0_i32_15 = arith.constant 0 : i32
    %19 = arith.cmpi eq, %arg1, %c0_i32_15 : i32
    %20 = arith.extui %19 : i1 to i32
    %c0_i32_16 = arith.constant 0 : i32
    %21 = arith.cmpi ne, %20, %c0_i32_16 : i32
    scf.if %21 {
      %c0_17 = arith.constant 0 : index
      %c0_18 = arith.constant 0 : index
      %22 = vector.load %arg8[%c0_17, %c0_18] : memref<8x128xf32, #tpu.memory_space<vmem>>, vector<8x128xf32>
      %c0_19 = arith.constant 0 : index
      %c0_20 = arith.constant 0 : index
      %23 = vector.load %arg6[%c0_19, %c0_20] : memref<1x128xf32, #tpu.memory_space<vmem>>, vector<1x128xf32>
      %24 = vector.broadcast %23 : vector<1x128xf32> to vector<8x128xf32>
      %25 = arith.addf %22, %24 : vector<8x128xf32>
      %c0_21 = arith.constant 0 : index
      %c0_22 = arith.constant 0 : index
      %26 = vector.load %arg7[%c0_21, %c0_22] : memref<8x128xf32, #tpu.memory_space<vmem>>, vector<8x128xf32>
      tpu.vector_store %arg7[%c0_21, %c0_22], %25 {strides = array<i32>} : memref<8x128xf32, #tpu.memory_space<vmem>>, vector<8x128xf32>,
    } else {
    }
    return
  }
  func.func @transform_0(%arg0: i32, %arg1: i32) -> (i32, i32) {
    %c0_i32 = arith.constant 0 : i32
    %c0_i32_0 = arith.constant 0 : i32
    return %arg0, %c0_i32 : i32, i32
  }
  func.func @transform_1(%arg0: i32, %arg1: i32) -> (i32, i32) {
    %c0_i32 = arith.constant 0 : i32
    %c0_i32_0 = arith.constant 0 : i32
    return %c0_i32, %arg1 : i32, i32
  }
  func.func @transform_2(%arg0: i32, %arg1: i32) -> (i32, i32) {
    %c0_i32 = arith.constant 0 : i32
    %c0_i32_0 = arith.constant 0 : i32
    return %c0_i32, %arg1 : i32, i32
  }
  func.func @transform_3(%arg0: i32, %arg1: i32) -> (i32, i32) {
    %c0_i32 = arith.constant 0 : i32
    %c0_i32_0 = arith.constant 0 : i32
    return %arg1, %c0_i32 : i32, i32
  }
  func.func @transform_4(%arg0: i32, %arg1: i32) -> (i32, i32) {
    %c0_i32 = arith.constant 0 : i32
    %c0_i32_0 = arith.constant 0 : i32
    %c0_i32_1 = arith.constant 0 : i32
    return %c0_i32, %c0_i32_0 : i32, i32
  }
  func.func @transform_5(%arg0: i32, %arg1: i32) -> (i32, i32) {
    %c0_i32 = arith.constant 0 : i32
    %c0_i32_0 = arith.constant 0 : i32
    return %arg0, %c0_i32 : i32, i32
  }
}

</mosaic_0001>

<bundles_post_ra>
// kernel: tpu_custom_call.1
= control target key start
LH: loop header
LB: loop body
LE: loop exit
PB: predicated region body
PF: predicated region fallthrough
CT: control target
= control target key end

     0   :  { %s1284_s0 = inlined_call_operand.hbm [shape: f32[16,128], index: 0, kind: input, shape index: {}]   ;;  %s1285_s1 = inlined_call_operand.hbm [shape: f32[128,128], index: 1, kind: input, shape index: {}]   ;;  %s1286_s2 = inlined_call_operand.vmem [shape: f32[1,128], index: 2, kind: input, shape index: {}]   ;;  %s1287_s3 = inlined_call_operand.hbm [shape: f32[128,128], index: 3, kind: input, shape index: {}]   ;;  %s1288_s4 = inlined_call_operand.vmem [shape: f32[1,128], index: 4, kind: input, shape index: {}]   ;;  %s1289_s5 = inlined_call_operand.hbm [shape: f32[16,128], index: 5, kind: output, shape index: {}]  }
   0x1   :  { %1293 = sst [smem:[#allocation13_spill]] %s1285_s1 }
   0x2   :  { %10 = vsyncpa [#allocation4], 0 }
   0x3   :  { %12 = vsyncpa [#allocation4 + $0x1], 0 }
   0x4   :  { %13 = vsyncpa [#allocation7], 0 }
   0x5   :  { %14 = vsyncpa [#allocation5], 0 }
   0x6   :  { %16 = vsyncpa [#allocation5 + $0x1], 0  ;;  %s1057_s18 = smov 0   ;;  %s1059_s19 = smov 0  }
   0x7   :  { %s1061_s20 = smov 0   ;;  %s1063_s21 = smov 0  }
   0x8   :  { %s1065_s22 = smov 0   ;;  %s1067_s23 = smov 0  }
   0x9 LB: > { %s642_s24 = sadd.s32 4294967295, %s1017_s23   ;;  %s643_s25 = sadd.s32 4294967294, %s1017_s23   ;;  %s1017_s23 = sphi %s1067_s23, %s22_s23   ;;  %s1013_s22 = sphi %s1065_s22, %s1311_s22   ;;  %s1009_s21 = sphi %s1063_s21, %s1310_s21   ;;  %s1005_s20 = sphi %s1061_s20, %s1309_s20   ;;  %s1001_s19 = sphi %s1059_s19, %s1308_s19   ;;  %s997_s18 = sphi %s1057_s18, %s1307_s18  }
   0xa   : > { %p54_p0 = scmp.ne.s32.totalorder %s1001_s19, %s997_s18  ;;  %p1091_p1 = scmp.eq.s32.totalorder %s642_s24, 0 }
   0xb   : > { %p1095_p2 = scmp.eq.s32.totalorder %s642_s24, 1  ;;  %p183_p3 = scmp.eq.s32.totalorder %s643_s25, 1 }
   0xc   : > { %s1294_s26 = scalar_select %p1091_p1, 1, 0 }
   0xd   : > { %p1101_p4 = por %p1091_p1, %p54_p0  ;;  %p644_p5 = scmp.ge.s32.totalorder %s1017_s23, 1 }
   0xe   : > { %p1106_p6 = por %p183_p3, %p54_p0  ;;  %p190_p7 = scmp.lt.s32.totalorder %s1017_s23, 3 }
   0xf   : > { %s1296_s28 = scalar_select %p1101_p4, 1, 0 }
  0x10   : > { %s1297_s29 = scalar_select %p1106_p6, 1, 0 }
  0x11   : > { %p1111_p8 = pnand %p644_p5, %p190_p7  ;;  %s1019_s6 = smov [#allocation6]  }
  0x12   : > { %s204_s7 = sshll.u32 %s1019_s6, 4  ;;  %s1020_s9 = smov [#allocation8]   ;;  %s205_s7 = int_to_ptr.vmem [resolvable:$true] %s204_s7 }
  0x13   : > { %p778_p9 = pneg %p1111_p8  ;;  %s226_s10 = sshll.u32 %s1020_s9, 4  ;;  %s227_s10 = int_to_ptr.vmem [resolvable:$true] %s226_s10 }
  0x14   : > { %s864_s11 = scalar_lea.vmem %s205_s7, 2048  ;;  %p872_p5 = scmp.lt.s32.totalorder %s205_s7, %s205_s7 }
  0x15   : > { %p1120_p11 = pnand %p778_p9, %p1091_p1  ;;  %p865_p13 = scmp.ne.s32.totalorder %s205_s7, %s864_s11 }
  0x16   : > { %p873_p7 = scmp.lt.s32.totalorder %s864_s11, %s864_s11 }
  0x17   : > { %p855_p12 = pneg %p1120_p11 }
  0x18   : > { %p874_p10 = por %p873_p7, %p872_p5 }
  0x19   : > { %p867_p0 = pnand %p865_p13, %p855_p12 }
  0x1b   : > { %p868_p3 = pneg %p867_p0 }
  0x1d   : > { %p875_p9 = pnand %p874_p10, %p868_p3 }
  0x1f   : > { %878 = shalt.err (!%p875_p9)
}
  0x20   : > { %s1021_s12 = smov 128   ;;  %s1022_s13 = smov 8  }
  0x21   : > { %s1300_s1 = sld [smem:[#allocation13_spill]]  ;;  %s890_s16 = scalar_lea.vmem %s227_s10, 2048 }
  0x22   : > { %p891_p6 = scmp.ne.s32.totalorder %s227_s10, %s890_s16  ;;  %p898_p1 = scmp.lt.s32.totalorder %s227_s10, %s227_s10 }
  0x23   : > { %p899_p4 = scmp.lt.s32.totalorder %s890_s16, %s890_s16 }
  0x24   : > { %p893_p13 = pnand %p891_p6, %p855_p12 }
  0x25   : > { %p900_p5 = por %p899_p4, %p898_p1 }
  0x26   : > { %p894_p0 = pneg %p893_p13 }
  0x27   : > { %781 = dma.hbm_to_vmem [thread:$0]  (!%p1120_p11), %s1300_s1, 2048, %s205_s7, [#allocation7], %s1021_s12, %s1021_s12, %s1022_s13  }
  0x28   : > { %p901_p10 = pnand %p900_p5, %p894_p0 }
  0x2a   : > { %904 = shalt.err (!%p901_p10)
}
  0x2b   : > { %784 = dma.hbm_to_vmem [thread:$0]  (!%p1120_p11), %s1287_s3, 2048, %s227_s10, [#allocation7], %s1021_s12, %s1021_s12, %s1022_s13  }
  0x2c   : > { %s34_s25 = sadd.s32 1, %s1013_s22  ;;  %s41_s6 = sadd.s32 1, %s1005_s20 }
  0x2d   : > { %p36_p1 = scmp.ge.s32.totalorder %s34_s25, 2  ;;  %p48_p4 = scmp.ne.s32.totalorder %s1005_s20, %s1001_s19 }
  0x2e   : > { %p49_p6 = scmp.eq.s32.totalorder %s1017_s23, 0  ;;  %p795_p12 = scmp.lt.s32.totalorder %s1017_s23, 2 }
  0x2f   : > { %s1313_s25 = smov (%p36_p1, %s34_s25), 0  ;;  %p1152_p7 = por %p1095_p2, %p48_p4 }
  0x30   : > { %p50_p3 = por %p49_p6, %p48_p4  ;;  %s38_s8 = ssub.s32 %s1013_s22, %s1313_s25 }
  0x31   : > { %s243_s9 = sand.u32 1, %s1005_s20   ;;  %p39_p9 = scmp.eq.s32.totalorder %s38_s8, 0 }
  0x32   : > { %s649_s10 = sshll.u32 %s243_s9, 3  ;;  %s650_s11 = sshll.u32 %s1013_s22, 7 }
  0x33   : > { %s1161_s12 = scalar_select %p39_p9, %s1005_s20, %s41_s6  }
  0x34   : > { %s252_s15 = scalar_lea.hbm %s1284_s0, %s650_s11  ;;  %s247_s16 = scalar_lea.vmem [#allocation3], %s649_s10 }
  0x35   : > { %s254_s17 = sshll.u32 %s247_s16, 4  ;;  %p1168_p11 = pnand %p795_p12, %p50_p3  ;;  %s255_s17 = int_to_ptr.vmem [resolvable:$true] %s254_s17 }
  0x36   : > { %s244_s24 = scalar_lea.sflag [#allocation4], %s243_s9  ;;  %s918_s8 = scalar_lea.vmem %s255_s17, 128 }
  0x37   : > { %p907_p2 = pneg %p1168_p11  ;;  %p919_p13 = scmp.ne.s32.totalorder %s255_s17, %s918_s8 }
  0x38   : > { %s1023_s6 = smov [#allocation3]  }
  0x39   : > { %p921_p0 = pnand %p919_p13, %p907_p2  ;;  %s923_s1 = sshll.u32 %s1023_s6, 4  ;;  %s924_s1 = int_to_ptr.vmem [resolvable:$false] %s923_s1 }
  0x3a   : > { %s925_s11 = scalar_lea.vmem %s924_s1, 256  ;;  %p926_p10 = scmp.lt.s32.totalorder %s255_s17, %s924_s1 }
  0x3b   : > { %p922_p5 = pneg %p921_p0  ;;  %p927_p1 = scmp.lt.s32.totalorder %s925_s11, %s918_s8 }
  0x3d   : > { %p928_p4 = por %p927_p1, %p926_p10 }
  0x3f   : > { %p929_p6 = pnand %p928_p4, %p922_p5 }
  0x41   : > { %932 = shalt.err (!%p929_p6)
}
  0x42   : > { %788 = dma.hbm_to_vmem [thread:$0]  (!%p1168_p11), %s252_s15, 128, %s255_s17, %s244_s24  }
  0x43   : > { %263 = sbr.rel (%p1111_p8) target bundleno = 516 (0x204), region = 40  ;;  %s1179_s9 = sand.u32 (!%p1111_p8), 1, %s1001_s19  }
  0x44   : > { %s652_s10 = sshll.u32 (!%p1111_p8), %s1179_s9, 3  ;;  %s266_s13 = scalar_lea.sflag (!%p1111_p8), [#allocation4], %s1179_s9 }
  0x45   : > { %s1185_s1 = scalar_lea.vmem (!%p1111_p8), [#allocation3], %s652_s10  ;;  %p1303_p12 = scmp.ne.s32.totalorder (!%p1111_p8), %s1296_s28, 0 }
  0x48   : > { %984 = dma.done.wait (%p1303_p12), %s266_s13, 128  }
  0x49   : > { %986 = vsyncadd (%p1303_p12), %s266_s13, 4294967168  ;;  %p1304_p3 = scmp.ne.s32.totalorder %s1294_s26, 0 }
  0x4b   : > { %988 = dma.done.wait (%p1304_p3), [#allocation7], 4096  }
  0x4c   : > { %990 = vsyncadd (%p1304_p3), [#allocation7], 4294963200  ;;  %v1024_v0 = vmov 0.0   ;;  %vm1025_vm0 = vmmov 0   ;;  %v332_v1 = vld [vmem:[#allocation6 + $0x78] sm:$0xff]  ;;  %v331_v2 = vld [vmem:[#allocation6 + $0x70] sm:$0xff] }
  0x4d   : > { %696 = vmatprep.subr.mxu0 %v1024_v0  ;;  %728 = vmatprep.mubr.msk.f32.mxu0 %vm1025_vm0, %v1024_v0  ;;  %v330_v3 = vld [vmem:[#allocation6 + $0x68] sm:$0xff]  ;;  %v329_v4 = vld [vmem:[#allocation6 + $0x60] sm:$0xff]  ;;  %v429_v5 = vld [vmem:[#allocation8 + $0x78] sm:$0xff]  ;;  %s659_s15 = sshll.u32 %s1009_s21, 7  ;;  %s306_s16 = scalar_lea.vmem [#allocation9], %s652_s10 }
  0x4e   : > { %731 = vmatprep.subr.mxu1 %v1024_v0  ;;  %763 = vmatprep.mubr.msk.f32.mxu1 %vm1025_vm0, %v1024_v0  ;;  %v328_v6 = vld [vmem:[#allocation6 + $0x58] sm:$0xff]  ;;  %v428_v7 = vld [vmem:[#allocation8 + $0x70] sm:$0xff]  ;;  %v427_v8 = vld [vmem:[#allocation8 + $0x68] sm:$0xff]  ;;  %s529_s17 = sshll.u32 %s306_s16, 4  ;;  %s1242_s8 = scalar_lea.hbm %s1289_s5, %s659_s15  ;;  %s530_s17 = int_to_ptr.vmem [resolvable:$true] %s529_s17 }
  0x4f   : > { %697 = vmatpush3.msra.mxu0 %v332_v1  ;;  %732 = vmatpush3.msra.mxu1 %v429_v5  ;;  %v327_v9 = vld [vmem:[#allocation6 + $0x50] sm:$0xff]  ;;  %v426_v10 = vld [vmem:[#allocation8 + $0x60] sm:$0xff]  ;;  %v326_v11 = vld [vmem:[#allocation6 + $0x48] sm:$0xff]  ;;  %s516_s6 = scalar_lea.sflag [#allocation5], %s1179_s9  ;;  %s933_s11 = scalar_lea.vmem %s530_s17, 128 }
  0x50   : > { %698 = vmatprep.subr.mxu0 %v1024_v0  ;;  %733 = vmatprep.subr.mxu1 %v1024_v0  ;;  %v425_v12 = vld [vmem:[#allocation8 + $0x58] sm:$0xff]  ;;  %v325_v13 = vld [vmem:[#allocation6 + $0x40] sm:$0xff]  ;;  %v424_v14 = vld [vmem:[#allocation8 + $0x50] sm:$0xff]  ;;  %p934_p8 = scmp.ne.s32.totalorder %s530_s17, %s933_s11  ;;  %s1026_s21 = smov [#allocation9]  }
  0x51   : > { %699 = vmatpush3.msra.mxu0 %v331_v2  ;;  %734 = vmatpush3.msra.mxu1 %v428_v7  ;;  %v324_v15 = vld [vmem:[#allocation6 + $0x38] sm:$0xff]  ;;  %v423_v16 = vld [vmem:[#allocation8 + $0x48] sm:$0xff]  ;;  %v323_v17 = vld [vmem:[#allocation6 + $0x30] sm:$0xff]  ;;  %s937_s13 = sshll.u32 %s1026_s21, 4  ;;  %s938_s13 = int_to_ptr.vmem [resolvable:$false] %s937_s13 }
  0x52   : > { %700 = vmatprep.subr.mxu0 %v1024_v0  ;;  %735 = vmatprep.subr.mxu1 %v1024_v0  ;;  %v422_v18 = vld [vmem:[#allocation8 + $0x40] sm:$0xff]  ;;  %v322_v19 = vld [vmem:[#allocation6 + $0x28] sm:$0xff]  ;;  %v421_v20 = vld [vmem:[#allocation8 + $0x38] sm:$0xff]  ;;  %p935_p9 = pnand %p934_p8, %p1152_p7  ;;  %s939_s10 = scalar_lea.vmem %s938_s13, 256 }
  0x53   : > { %701 = vmatpush3.msra.mxu0 %v330_v3  ;;  %736 = vmatpush3.msra.mxu1 %v427_v8  ;;  %v321_v21 = vld [vmem:[#allocation6 + $0x20] sm:$0xff]  ;;  %v420_v22 = vld [vmem:[#allocation8 + $0x30] sm:$0xff]  ;;  %v320_v23 = vld [vmem:[#allocation6 + $0x18] sm:$0xff]  ;;  %p940_p2 = scmp.lt.s32.totalorder %s530_s17, %s938_s13  ;;  %p941_p13 = scmp.lt.s32.totalorder %s939_s10, %s933_s11 }
  0x54   : > { %702 = vmatprep.subr.mxu0 %v1024_v0  ;;  %737 = vmatprep.subr.mxu1 %v1024_v0  ;;  %v419_v24 = vld [vmem:[#allocation8 + $0x28] sm:$0xff]  ;;  %v319_v25 = vld [vmem:[#allocation6 + $0x10] sm:$0xff]  ;;  %v418_v26 = vld [vmem:[#allocation8 + $0x20] sm:$0xff]  ;;  %p936_p11 = pneg %p935_p9 }
  0x55   : > { %703 = vmatpush3.msra.mxu0 %v329_v4  ;;  %738 = vmatpush3.msra.mxu1 %v426_v10  ;;  %v318_v27 = vld [vmem:[#allocation6 + $0x8] sm:$0xff]  ;;  %v417_v28 = vld [vmem:[#allocation8 + $0x18] sm:$0xff]  ;;  %v317_v29 = vld [vmem:[#allocation6] sm:$0xff]  ;;  %p942_p0 = por %p941_p13, %p940_p2 }
  0x56   : > { %704 = vmatprep.subr.mxu0 %v1024_v0  ;;  %739 = vmatprep.subr.mxu1 %v1024_v0  ;;  %v316_v30 = vld [vmem:[%s1185_s1] sm:$0xff]  ;;  %v415_v32 = vld [vmem:[#allocation8 + $0x8] sm:$0xff]  ;;  %v414_v33 = vld [vmem:[#allocation8] sm:$0xff] }
  0x57   : > { %705 = vmatpush3.msra.mxu0 %v328_v6  ;;  %740 = vmatpush3.msra.mxu1 %v425_v12  ;;  %v416_v31 = vld [vmem:[#allocation8 + $0x10] sm:$0xff]  ;;  %p943_p5 = pnand %p942_p0, %p936_p11 }
  0x58   : > { %706 = vmatprep.subr.mxu0 %v1024_v0  ;;  %741 = vmatprep.subr.mxu1 %v1024_v0  ;;  %v656_v34 = vld [vmem:[%s1286_s2] ss:$0 sm:$0xff] }
  0x59   : > { %707 = vmatpush3.msra.mxu0 %v327_v9  ;;  %742 = vmatpush3.msra.mxu1 %v424_v14  ;;  %v657_v40 = vld [vmem:[%s1288_s4] ss:$0 sm:$0xff] }
  0x5a   : > { %708 = vmatprep.subr.mxu0 %v1024_v0  ;;  %743 = vmatprep.subr.mxu1 %v1024_v0 }
  0x5b   : > { %709 = vmatpush3.msra.mxu0 %v326_v11  ;;  %744 = vmatpush3.msra.mxu1 %v423_v16 }
  0x5c   : > { %710 = vmatprep.subr.mxu0 %v1024_v0  ;;  %745 = vmatprep.subr.mxu1 %v1024_v0 }
  0x5d   : > { %711 = vmatpush3.msra.mxu0 %v325_v13  ;;  %746 = vmatpush3.msra.mxu1 %v422_v18 }
  0x5e   : > { %712 = vmatprep.subr.mxu0 %v1024_v0  ;;  %747 = vmatprep.subr.mxu1 %v1024_v0 }
  0x5f   : > { %713 = vmatpush3.msra.mxu0 %v324_v15  ;;  %748 = vmatpush3.msra.mxu1 %v421_v20 }
  0x60   : > { %714 = vmatprep.subr.mxu0 %v1024_v0  ;;  %749 = vmatprep.subr.mxu1 %v1024_v0 }
  0x61   : > { %715 = vmatpush3.msra.mxu0 %v323_v17  ;;  %750 = vmatpush3.msra.mxu1 %v420_v22 }
  0x62   : > { %716 = vmatprep.subr.mxu0 %v1024_v0  ;;  %751 = vmatprep.subr.mxu1 %v1024_v0 }
  0x63   : > { %717 = vmatpush3.msra.mxu0 %v322_v19  ;;  %752 = vmatpush3.msra.mxu1 %v419_v24 }
  0x64   : > { %718 = vmatprep.subr.mxu0 %v1024_v0  ;;  %753 = vmatprep.subr.mxu1 %v1024_v0 }
  0x65   : > { %719 = vmatpush3.msra.mxu0 %v321_v21  ;;  %754 = vmatpush3.msra.mxu1 %v418_v26 }
  0x66   : > { %720 = vmatprep.subr.mxu0 %v1024_v0  ;;  %755 = vmatprep.subr.mxu1 %v1024_v0 }
  0x67   : > { %721 = vmatpush3.msra.mxu0 %v320_v23  ;;  %756 = vmatpush3.msra.mxu1 %v417_v28 }
  0x68   : > { %722 = vmatprep.subr.mxu0 %v1024_v0  ;;  %757 = vmatprep.subr.mxu1 %v1024_v0 }
  0x69   : > { %723 = vmatpush3.msra.mxu0 %v319_v25  ;;  %758 = vmatpush3.msra.mxu1 %v416_v31 }
  0x6a   : > { %724 = vmatprep.subr.mxu0 %v1024_v0  ;;  %759 = vmatprep.subr.mxu1 %v1024_v0 }
  0x6b   : > { %725 = vmatpush3.msra.mxu0 %v318_v27  ;;  %760 = vmatpush3.msra.mxu1 %v415_v32 }
  0x6c   : > { %726 = vmatprep.subr.mxu0 %v1024_v0  ;;  %761 = vmatprep.subr.mxu1 %v1024_v0 }
  0x6d   : > { %727 = vmatpush3.msra.mxu0 %v317_v29  ;;  %762 = vmatpush3.msra.mxu1 %v414_v33 }
  0x6e   : > { %729 = vmatmul.mubr.f32.vlgmr.msra.gmra.mxu0 %v316_v30 }
 0x12e   : > { %v406_v35 = vpop.f32.mrf.mxu0 }
 0x12f   : > { %v407_v36 = vadd.f32 %v656_v34, %v406_v35 }
 0x130   : > { %v730_v37 = vpop.f32.mrf.mxu0 }
 0x131   : > { %v411_v38 = vmul.f32 0.01, %v407_v36  ;;  %vm410_vm1 = vcmp.gt.f32.partialorder %v407_v36, 0.0 }
 0x133   : > { %v412_v39 = vsel %vm410_vm1, %v407_v36, %v411_v38 }
 0x134   : > { %764 = vmatmul.mubr.f32.vlgmr.msra.gmra.mxu1 %v412_v39 }
 0x1f4   : > { %v496_v41 = vpop.f32.mrf.mxu1 }
 0x1f5   : > { %v513_v42 = vadd.f32 %v657_v40, %v496_v41 }
 0x1f6   : > { %v765_v43 = vpop.f32.mrf.mxu1 }
 0x1f7   : > { %514 = vst [vmem:[%s306_s16] sm:$0xff] %v513_v42 }
 0x1f8   : > { %946 = shalt.err (!%p943_p5)
}
 0x1f9   : > { %s947_s1 = scalar_lea.hbm %s1242_s8, 128  ;;  %s951_s28 = scalar_lea.hbm %s1289_s5, 256 }
 0x1fa   : > { %p948_p10 = scmp.ne.s32.totalorder %s1242_s8, %s947_s1  ;;  %p952_p6 = scmp.lt.s32.totalorder %s1242_s8, %s1289_s5 }
 0x1fb   : > { %p953_p12 = scmp.lt.s32.totalorder %s951_s28, %s947_s1 }
 0x1fc   : > { %p949_p1 = pnand %p948_p10, %p1152_p7 }
 0x1fd   : > { %p954_p3 = por %p953_p12, %p952_p6 }
 0x1fe   : > { %p950_p4 = pneg %p949_p1 }
 0x200   : > { %p955_p8 = pnand %p954_p3, %p950_p4 }
 0x202   : > { %958 = shalt.err (!%p955_p8)
}
 0x203   : > { %776 = dma.vmem_to_hbm [thread:$0]  (%p1152_p7), %s530_s17, 128, %s1242_s8, %s516_s6  }
 0x204 PF: > { %s541_s15 = sand.u32 1, %s997_s18   ;;  %p1305_p9 = scmp.ne.s32.totalorder %s1297_s29, 0 }
 0x205   : > { %p1306_p11 = scmp.ge.s32.totalorder %s1017_s23, 2  ;;  %s542_s16 = scalar_lea.sflag [#allocation5], %s541_s15 }
 0x207   : > { %p790_p2 = pnand %p1306_p11, %p1305_p9 }
 0x209   : > { %p791_p13 = pneg %p790_p2 }
 0x20b   : > { %992 = dma.done.wait (%p791_p13), %s542_s16, 128  }
 0x20c   : > { %994 = vsyncadd (%p791_p13), %s542_s16, 4294967168  ;;  %s22_s23 = sadd.s32 1, %s1017_s23   ;;  %s1307_s18 = smov %s1001_s19 }
 0x20d   : > { %p19_p0 = scmp.ge.s32.totalorder %s22_s23, 4   ;;  %s1308_s19 = smov %s1005_s20 }
 0x20e   : > { %s1309_s20 = smov %s1161_s12  ;;  %s1310_s21 = smov %s1013_s22 }
 0x20f   : > { %s1311_s22 = smov %s1313_s25  ;;  %21 = sbr.rel (!%p19_p0) target bundleno = 9 (0x9), region = 106 }
 0x214   :  { %547 = vsyncpa [#allocation4], 1 }
 0x215   :  { %549 = vsyncpa [#allocation4 + $0x1], 1 }
 0x216   :  { %550 = vsyncpa [#allocation7], 1 }
 0x217   :  { %551 = vsyncpa [#allocation5], 1 }
 0x218   :  { %553 = vsyncpa [#allocation5 + $0x1], 1 }

</bundles_post_ra>
